<compile_context>
chip_gen: v6e
topology: v6e:2x2x1
jax: 0.10.0
libtpu: 0.0.40
codegen_flags: <defaults>
</compile_context>

<pallas_src>
import jax
import jax.numpy as jnp
from jax.experimental import pallas as pl
from jax.experimental.pallas import tpu as pltpu

_MAX_TILE_N = 8192   # pixels per grid step (multiple of 128)


def _round_up(x: int, m: int) -> int:
    return ((x + m - 1) // m) * m


def _hwc_to_chw_kernel(x_ref, o_ref):
    # x_ref: (tn, 3) uint8 tile of the flattened HWC image
    # o_ref: (3, tn) uint8 tile of the CHW output
    #
    # Build the 3x3 identity in-kernel (no extra input stream / DMA).
    row = jax.lax.broadcasted_iota(jnp.int32, (3, 3), 0)
    col = jax.lax.broadcasted_iota(jnp.int32, (3, 3), 1)
    eye = jnp.where(row == col, 1.0, 0.0).astype(jnp.bfloat16)

    # uint8 -> f32 -> bf16 is exact for 0..255 and lowers on every TPU gen.
    x = x_ref[...].astype(jnp.float32).astype(jnp.bfloat16)      # (tn, 3)

    # out[c, n] = sum_k I[c, k] * x[n, k] = x[n, c]   (MXU, rhs-transposed form)
    xt = jax.lax.dot_general(
        eye, x,
        dimension_numbers=(((1,), (1,)), ((), ())),
        preferred_element_type=jnp.float32,
    )                                                            # (3, tn)
    o_ref[...] = xt.astype(jnp.uint8)


class ChipTransformsForConvNext2:
    """JAX/Pallas port of chip_transforms_for_convNext2."""

    def __init__(self, light_num: int = 4):
        if not isinstance(light_num, int):
            raise TypeError(f"Size should be int or sequence. Got {type(light_num)}")
        if light_num not in (3, 4):
            raise ValueError("Light_num should be 3 or 4")
        self.light_num = light_num
        # NOTE: the reference module has no learnable parameters.

    def __call__(self, image_hwc_u8: jax.Array, *, tile_n: int | None = None) -> jax.Array:
        # image_hwc_u8: (H, W, 3) uint8, i.e. np.array(pil_image.convert('RGB')).
        # TODO(synk): PIL `Image.convert('RGB')` mode/palette decoding has no
        # Pallas equivalent; inputs are assumed to already be RGB uint8 HWC.
        H, W, C = image_hwc_u8.shape
        assert C == 3, "expected an RGB (H, W, 3) image"
        N = H * W

        if tile_n is None:
            tile_n = min(_MAX_TILE_N, _round_up(N, 128))
        assert tile_n % 128 == 0, "tile_n must be a multiple of 128"
        tn = tile_n

        # Free, contiguous views -- no extra HBM passes (no pad, no slice).
        x2d = image_hwc_u8.reshape(N, C)

        out2d = pl.pallas_call(
            _hwc_to_chw_kernel,
            out_shape=jax.ShapeDtypeStruct((C, N), jnp.uint8),
            grid_spec=pltpu.PrefetchScalarGridSpec(
                num_scalar_prefetch=0,
                grid=(pl.cdiv(N, tn),),
                in_specs=[
                    pl.BlockSpec((tn, C), lambda i: (i, 0)),   # HWC pixel tile
                ],
                # Pallas masks the ragged last block's out-of-bounds columns.
                out_specs=pl.BlockSpec((C, tn), lambda i: (0, i)),
            ),
            compiler_params=pltpu.CompilerParams(
                dimension_semantics=("parallel",),
            ),
        )(x2d)

        return out2d.reshape(C, H, W)                # CHW, matches torch forward


if __name__ == "__main__":
    key = jax.random.PRNGKey(0)
    k1, k2 = jax.random.split(key)
    transform = ChipTransformsForConvNext2(light_num=4)

    # Case 1: tiny image, single exact block with the default (auto) tile.
    img1 = jax.random.randint(k1, (16, 16, 3), 0, 256, dtype=jnp.int32).astype(jnp.uint8)
    out1 = jax.block_until_ready(transform(img1))
    ref1 = jnp.transpose(img1, (2, 0, 1))
    assert out1.shape == (3, 16, 16)
    assert out1.dtype == jnp.uint8
    assert bool(jnp.all(out1 == ref1))

    # Case 2: odd spatial size + small tile -> multi-step grid with a ragged
    # (masked) last block, exercising the no-pad / no-slice path.
    img2 = jax.random.randint(k2, (37, 29, 3), 0, 256, dtype=jnp.int32).astype(jnp.uint8)
    out2 = jax.block_until_ready(transform(img2, tile_n=256))
    ref2 = jnp.transpose(img2, (2, 0, 1))
    assert out2.shape == (3, 37, 29)
    assert out2.dtype == jnp.uint8
    assert bool(jnp.all(out2 == ref2))

    print("KERNEL_OK")
</pallas_src>

<mosaic_0001>
module attributes {stable_mosaic.version = 11 : i64} {
  func.func @_hwc_to_chw_kernel(%arg0: i32, %arg1: memref<256x3xi8, #tpu.memory_space<vmem>>, %arg2: memref<3x256xi8, #tpu.memory_space<vmem>>) attributes {dimension_semantics = [#tpu.dimension_semantics<parallel>], iteration_bounds = array<i64: 1>, scalar_prefetch = 0 : i64, scratch_operands = 0 : i64, tpu.core_type = #tpu.core_type<tc>, window_params = [{transform_indices = @transform_0, window_bounds = array<i64: 256, 3>}, {transform_indices = @transform_1, window_bounds = array<i64: 3, 256>}]} {
    %0 = tpu.iota {dimensions = array<i32: 0>} : vector<3x3xi32>
    %1 = tpu.iota {dimensions = array<i32: 1>} : vector<3x3xi32>
    %2 = arith.cmpi eq, %0, %1 : vector<3x3xi32>
    %cst = arith.constant 1.000000e+00 : f32
    %cst_0 = arith.constant 0.000000e+00 : f32
    %3 = vector.broadcast %cst : f32 to vector<3x3xf32>
    %4 = vector.broadcast %cst_0 : f32 to vector<3x3xf32>
    %5 = arith.select %2, %3, %4 : vector<3x3xi1>, vector<3x3xf32>
    %6 = arith.truncf %5 : vector<3x3xf32> to vector<3x3xbf16>
    %c0 = arith.constant 0 : index
    %c0_1 = arith.constant 0 : index
    %7 = vector.load %arg1[%c0, %c0_1] : memref<256x3xi8, #tpu.memory_space<vmem>>, vector<256x3xi8>
    %8 = arith.uitofp %7 : vector<256x3xi8> to vector<256x3xf32>
    %9 = arith.truncf %8 : vector<256x3xf32> to vector<256x3xbf16>
    %cst_2 = arith.constant dense<0.000000e+00> : vector<3x256xf32>
    %10 = tpu.matmul %6, %9, %cst_2 {dimension_numbers = #tpu.dot_dimension_numbers<[1], [1], [0], [0], [0, 0, 1, 0], [], []>} : vector<3x3xbf16>, vector<256x3xbf16>, vector<3x256xf32> -> vector<3x256xf32>
    %11 = arith.fptoui %10 : vector<3x256xf32> to vector<3x256xi8>
    %c0_3 = arith.constant 0 : index
    %c0_4 = arith.constant 0 : index
    %12 = vector.load %arg2[%c0_3, %c0_4] : memref<3x256xi8, #tpu.memory_space<vmem>>, vector<3x256xi8>
    tpu.vector_store %arg2[%c0_3, %c0_4], %11 {strides = array<i32>} : memref<3x256xi8, #tpu.memory_space<vmem>>, vector<3x256xi8>,
    return
  }
  func.func @transform_0(%arg0: i32) -> (i32, i32) {
    %c0_i32 = arith.constant 0 : i32
    %c0_i32_0 = arith.constant 0 : i32
    return %arg0, %c0_i32 : i32, i32
  }
  func.func @transform_1(%arg0: i32) -> (i32, i32) {
    %c0_i32 = arith.constant 0 : i32
    %c0_i32_0 = arith.constant 0 : i32
    return %c0_i32, %arg0 : i32, i32
  }
}

</mosaic_0001>

<bundles_post_ra>
// kernel: tpu_custom_call.1
= control target key start
LH: loop header
LB: loop body
LE: loop exit
PB: predicated region body
PF: predicated region fallthrough
CT: control target
= control target key end

     0   :  { %vm161_vm0 = vcmask 23552   ;;  %v10_v27 = vlaneseq  ;;  %s514_s0 = inlined_call_operand.vmem [shape: u8[256,3], index: 0, kind: input, shape index: {}]   ;;  %s515_s1 = inlined_call_operand.hbm [shape: u8[3,256], index: 1, kind: output, shape index: {}]  }
   0x1   :  { %v47_v0 = vld [vmem:[%s514_s0 + $0x3c] sm:$0x3]  ;;  %v48_v1 = vld [vmem:[%s514_s0 + $0x3e] sm:$0x3]  ;;  %v45_v6 = vld [vmem:[%s514_s0 + $0x38] sm:$0x3] }
   0x2   :  { %v79_v2 = vunpack.c.l.u8.bf16 %v47_v0  ;;  %v80_v3 = vunpack.c.l.u8.bf16 %v48_v1  ;;  %v31_v4 = vld [vmem:[%s514_s0 + $0x1c] sm:$0x3]  ;;  %v32_v5 = vld [vmem:[%s514_s0 + $0x1e] sm:$0x3]  ;;  %v46_v9 = vld [vmem:[%s514_s0 + $0x3a] sm:$0x3]  ;;  %v77_v10 = vunpack.c.l.u8.bf16 %v45_v6 }
   0x3   :  { %v63_v7 = vunpack.c.l.u8.bf16 %v31_v4  ;;  %v64_v8 = vunpack.c.l.u8.bf16 %v32_v5  ;;  %v29_v11 = vld [vmem:[%s514_s0 + $0x18] sm:$0x3]  ;;  %v30_v12 = vld [vmem:[%s514_s0 + $0x1a] sm:$0x3]  ;;  %v78_v14 = vunpack.c.l.u8.bf16 %v46_v9  ;;  %v43_v19 = vld [vmem:[%s514_s0 + $0x34] sm:$0x3] }
   0x4   :  { %v318_v13 = vcombine.low %v79_v2, %v80_v3  ;;  %v61_v16 = vunpack.c.l.u8.bf16 %v29_v11  ;;  %v62_v17 = vunpack.c.l.u8.bf16 %v30_v12  ;;  %v44_v20 = vld [vmem:[%s514_s0 + $0x36] sm:$0x3]  ;;  %v75_v23 = vunpack.c.l.u8.bf16 %v43_v19  ;;  %v27_v25 = vld [vmem:[%s514_s0 + $0x14] sm:$0x3] }
   0x5   :  { %v310_v15 = vcombine.low %v63_v7, %v64_v8  ;;  %v317_v18 = vcombine.low %v77_v10, %v78_v14  ;;  %v76_v24 = vunpack.c.l.u8.bf16 %v44_v20  ;;  %v28_v26 = vld [vmem:[%s514_s0 + $0x16] sm:$0x3]  ;;  %v59_v30 = vunpack.c.l.u8.bf16 %v27_v25 }
   0x6   :  { %339 = vmatprep.subr.msk.bf16.mxu0 %vm161_vm0, %v318_v13  ;;  %v309_v22 = vcombine.low %v61_v16, %v62_v17  ;;  %v60_v31 = vunpack.c.l.u8.bf16 %v28_v26 }
   0x7   :  { %v187_v21 = vsel %vm161_vm0, %v310_v15, 0  ;;  %v316_v29 = vcombine.low %v75_v23, %v76_v24 }
   0x8   :  { %322 = vmatpush3.bf16.xpose.msra.mxu0 %v187_v21  ;;  %v184_v28 = vsel %vm161_vm0, %v309_v22, 0 }
   0x9   :  { %340 = vmatprep.subr.msk.bf16.mxu0 %vm161_vm0, %v317_v18 }
   0xa   :  { %6 = vsyncpa [#allocation3], 0  ;;  %v41_v32 = vld [vmem:[%s514_s0 + $0x30] sm:$0x3]  ;;  %v42_v33 = vld [vmem:[%s514_s0 + $0x32] sm:$0x3]  ;;  %v308_v36 = vcombine.low %v59_v30, %v60_v31 }
   0xb   :  { %v435_v34 = vshrl.u32 %v10_v27, 7  ;;  %v13_v35 = vand.u32 127, %v10_v27  ;;  %v73_v37 = vunpack.c.l.u8.bf16 %v41_v32  ;;  %v74_v38 = vunpack.c.l.u8.bf16 %v42_v33  ;;  %v25_v39 = vld [vmem:[%s514_s0 + $0x10] sm:$0x3]  ;;  %v26_v40 = vld [vmem:[%s514_s0 + $0x12] sm:$0x3] }
   0xc   :  { %v376_v41 = vmov 0.0   ;;  %v181_v44 = vsel %vm161_vm0, %v308_v36, 0  ;;  %v57_v46 = vunpack.c.l.u8.bf16 %v25_v39  ;;  %v58_v47 = vunpack.c.l.u8.bf16 %v26_v40  ;;  %v39_v48 = vld [vmem:[%s514_s0 + $0x2c] sm:$0x3]  ;;  %v40_v49 = vld [vmem:[%s514_s0 + $0x2e] sm:$0x3] }
   0xd   :  { %vm14_vm1 = vcmp.eq.s32.totalorder %v435_v34, %v13_v35  ;;  %v315_v45 = vcombine.low %v73_v37, %v74_v38  ;;  %v71_v51 = vunpack.c.l.u8.bf16 %v39_v48  ;;  %v72_v52 = vunpack.c.l.u8.bf16 %v40_v49  ;;  %v23_v53 = vld [vmem:[%s514_s0 + $0xc] sm:$0x3]  ;;  %v24_v54 = vld [vmem:[%s514_s0 + $0xe] sm:$0x3]  ;;  %v37_v59 = vld [vmem:[%s514_s0 + $0x28] sm:$0x3] }
   0xe   :  { %v15_v42 = vsel %vm14_vm1, 1.0, %v376_v41  ;;  %v307_v50 = vcombine.low %v57_v46, %v58_v47  ;;  %v55_v57 = vunpack.c.l.u8.bf16 %v23_v53  ;;  %v56_v58 = vunpack.c.l.u8.bf16 %v24_v54  ;;  %v38_v60 = vld [vmem:[%s514_s0 + $0x2a] sm:$0x3]  ;;  %v21_v0 = vld [vmem:[%s514_s0 + $0x8] sm:$0x3] }
   0xf   :  { %v445_v43 = vpack.c.bf16 %v15_v42, %v15_v42  ;;  %v314_v56 = vcombine.low %v71_v51, %v72_v52  ;;  %v69_v62 = vunpack.c.l.u8.bf16 %v37_v59  ;;  %v70_v63 = vunpack.c.l.u8.bf16 %v38_v60  ;;  %v22_v1 = vld [vmem:[%s514_s0 + $0xa] sm:$0x3]  ;;  %v35_v6 = vld [vmem:[%s514_s0 + $0x24] sm:$0x3]  ;;  %v36_v7 = vld [vmem:[%s514_s0 + $0x26] sm:$0x3] }
  0x10   :  { %324 = vmatpush3.bf16.xpose.msra.mxu0 %v184_v28  ;;  %v178_v55 = vsel %vm161_vm0, %v307_v50, 0  ;;  %v306_v61 = vcombine.low %v55_v57, %v56_v58  ;;  %v53_v4 = vunpack.c.l.u8.bf16 %v21_v0  ;;  %v54_v5 = vunpack.c.l.u8.bf16 %v22_v1  ;;  %v19_v11 = vld [vmem:[%s514_s0 + $0x4] sm:$0x3]  ;;  %v20_v12 = vld [vmem:[%s514_s0 + $0x6] sm:$0x3] }
  0x11   :  { %341 = vmatprep.subr.msk.bf16.mxu0 %vm161_vm0, %v316_v29  ;;  %337 = vmatprep.mubr.msk.bf16.mxu0 %vm161_vm0, %v445_v43  ;;  %v313_v3 = vcombine.low %v69_v62, %v70_v63  ;;  %v67_v9 = vunpack.c.l.u8.bf16 %v35_v6  ;;  %v68_v10 = vunpack.c.l.u8.bf16 %v36_v7  ;;  %v51_v15 = vunpack.c.l.u8.bf16 %v19_v11  ;;  %v33_v17 = vld [vmem:[%s514_s0 + $0x20] sm:$0x3]  ;;  %v34_v18 = vld [vmem:[%s514_s0 + $0x22] sm:$0x3] }
  0x12   :  { %v175_v2 = vsel %vm161_vm0, %v306_v61, 0  ;;  %v305_v8 = vcombine.low %v53_v4, %v54_v5  ;;  %v52_v16 = vunpack.c.l.u8.bf16 %v20_v12  ;;  %v65_v20 = vunpack.c.l.u8.bf16 %v33_v17  ;;  %v17_v22 = vld [vmem:[%s514_s0] sm:$0x3]  ;;  %v18_v23 = vld [vmem:[%s514_s0 + $0x2] sm:$0x3]  ;;  %s378_s0 = smov [#allocation2]  }
  0x13   :  { %v312_v14 = vcombine.low %v67_v9, %v68_v10  ;;  %v66_v21 = vunpack.c.l.u8.bf16 %v34_v18  ;;  %v49_v26 = vunpack.c.l.u8.bf16 %v17_v22  ;;  %v50_v27 = vunpack.c.l.u8.bf16 %v18_v23  ;;  %s295_s12 = sshll.u32 %s378_s0, 4  ;;  %v286_v51 = vld [vmem:[#allocation2] sm:$0x3]  ;;  %s296_s12 = int_to_ptr.vmem [resolvable:$true] %s295_s12 }
  0x14   :  { %v172_v13 = vsel %vm161_vm0, %v305_v8, 0  ;;  %v304_v19 = vcombine.low %v51_v15, %v52_v16  ;;  %v377_v33 = vmov 1966171168   ;;  %vm279_vm2 = vcmask 1040384   ;;  %s354_s13 = scalar_lea.vmem %s296_s12, 32  ;;  %p359_p1 = scmp.lt.s32.totalorder %s296_s12, %s296_s12 }
  0x15   :  { %v311_v25 = vcombine.low %v65_v20, %v66_v21  ;;  %v303_v28 = vcombine.low %v49_v26, %v50_v27  ;;  %v266_v35 = vunpack.c.l.s4 %v377_v33  ;;  %vm280_vm3 = vsmask.f32 512  ;;  %p355_p0 = scmp.ne.s32.totalorder %s296_s12, %s354_s13  ;;  %p360_p2 = scmp.lt.s32.totalorder %s354_s13, %s354_s13 }
  0x16   :  { %v169_v24 = vsel %vm161_vm0, %v304_v19, 0  ;;  %vm282_vm4 = vcmask 1041409   ;;  %vm283_vm5 = vsmask.f32 1536  ;;  %vm281_vm6 = vmand %vm279_vm2, %vm280_vm3 }
  0x17   :  { %v166_v29 = vsel %vm161_vm0, %v303_v28, 0  ;;  %v267_v42 = vunpack.c.0.s8 %v266_v35  ;;  %vm284_vm7 = vmand %vm282_vm4, %vm283_vm5  ;;  %p361_p3 = por %p360_p2, %p359_p1 }
  0x18   :  { %326 = vmatpush3.bf16.xpose.msra.mxu0 %v181_v44  ;;  %vm285_vm8 = vmor %vm284_vm7, %vm281_vm6 }
  0x19   :  { %342 = vmatprep.subr.msk.bf16.mxu0 %vm161_vm0, %v315_v45  ;;  %p362_p4 = pnand %p361_p3, %p355_p0 }
  0x20   :  { %328 = vmatpush3.bf16.xpose.msra.mxu0 %v178_v55 }
  0x21   :  { %343 = vmatprep.subr.msk.bf16.mxu0 %vm161_vm0, %v314_v56 }
  0x28   :  { %330 = vmatpush3.bf16.xpose.msra.mxu0 %v175_v2 }
  0x29   :  { %344 = vmatprep.subr.msk.bf16.mxu0 %vm161_vm0, %v313_v3 }
  0x30   :  { %332 = vmatpush3.bf16.xpose.msra.mxu0 %v172_v13 }
  0x31   :  { %345 = vmatprep.subr.msk.bf16.mxu0 %vm161_vm0, %v312_v14 }
  0x38   :  { %334 = vmatpush3.bf16.xpose.msra.mxu0 %v169_v24 }
  0x39   :  { %346 = vmatprep.subr.msk.bf16.mxu0 %vm161_vm0, %v311_v25 }
  0x40   :  { %336 = vmatpush3.bf16.xpose.msra.mxu0 %v166_v29 }
  0x47   :  { %338 = vmatmul.mubr.msk.bf16.vlgmr.msra.gmra.mxu0 %vm161_vm0, %v445_v43  ;;  %v270_v43 = vsub.s32 %v267_v42, %v435_v34 }
 0x107   :  { %v247_v30 = vpop.f32.mrf.mxu0 }
 0x108   :  { %v254_v31 = vmax.f32 %v247_v30, 0.0 }
 0x109   :  { %v249_v32 = vpop.f32.mrf.mxu0 }
 0x10a   :  { %v256_v36 = vmin.f32 %v254_v31, 255.0  ;;  %v255_v37 = vmax.f32 %v249_v32, 0.0 }
 0x10b   :  { %v251_v38 = vpop.f32.mrf.mxu0 }
 0x10c   :  { %v347_v39 = vtrunc.f32 %v256_v36  ;;  %v257_v40 = vmin.f32 %v255_v37, 255.0 }
 0x10d   :  { %v252_v41 = vpop.f32.mrf.mxu0 }
 0x10e   :  { %v348_v44 = vcvt.f32.s32 %v347_v39  ;;  %v349_v45 = vtrunc.f32 %v257_v40 }
 0x110   :  { %v350_v46 = vcvt.f32.s32 %v349_v45  ;;  %v260_v47 = vpack.c.b16 %v348_v44, %v348_v44 }
 0x112   :  { %v262_v48 = vpack.c.b16 %v350_v46, %v350_v46 }
 0x114   :  { %v320_v49 = vpack.c.b8 %v262_v48, %v260_v47 }
 0x116   :  { %v271_v50 = vrot.slane %v320_v49, %v270_v43 }
 0x118   :  { %v278_v52 = vrot.slane %v271_v50, %v270_v43 }
 0x11a   :  { %v287_v53 = vsel %vm285_vm8, %v278_v52, %v286_v51 }
 0x11b   :  { %288 = vst [vmem:[#allocation2] sm:$0x3] %v287_v53 }
 0x11c   :  { %365 = shalt.err (!%p362_p4)
}
 0x11d   :  { %298 = dma.vmem_to_hbm [thread:$0]  %s296_s12, 32, %s515_s1, [#allocation3]  }
 0x11e   :  { %374 = dma.done.wait [#allocation3], 32  }
 0x11f   :  { %375 = vsyncadd [#allocation3], 4294967264 }
 0x120   :  { %302 = vsyncpa [#allocation3], 1 }

</bundles_post_ra>
